<compile_context>
chip_gen: v7x
topology: tpu7x:2x2x1
jax: 0.10.0
libtpu: 0.0.40
codegen_flags: <defaults>
</compile_context>

<pallas_src>
import functools

import jax
import jax.numpy as jnp
from jax import lax
from jax.experimental import pallas as pl
from jax.experimental.pallas import tpu as pltpu


# ---------------------------------------------------------------------------
# Kernels
# ---------------------------------------------------------------------------
def _conv_stats_kernel(w_ref, p_ref, y_ref, sum_ref, ssq_ref):
    """Pass 1: y = W @ P tile (MXU, f32 acc) + per-channel sum / sum-of-sq."""
    i = pl.program_id(0)
    y = jnp.dot(w_ref[...], p_ref[...], preferred_element_type=jnp.float32)
    y_ref[...] = y                                    # (Co_p, TM), lane-dense

    @pl.when(i == 0)
    def _init():
        sum_ref[...] = jnp.zeros_like(sum_ref)
        ssq_ref[...] = jnp.zeros_like(ssq_ref)

    # Global (over all M tiles) per-channel reduction; grid axis is "arbitrary".
    sum_ref[...] += jnp.sum(y, axis=1, keepdims=True)
    ssq_ref[...] += jnp.sum(y * y, axis=1, keepdims=True)


def _scale_shift_act_kernel(y_ref, sc_ref, sh_ref, o_ref, *, relu):
    """Pass 2: folded BatchNorm affine (per-channel) + optional ReLU."""
    y = y_ref[...] * sc_ref[...] + sh_ref[...]        # (Co_p,TM)*(Co_p,1)+...
    if relu:
        y = jnp.maximum(y, 0.0)
    o_ref[...] = y.astype(o_ref.dtype)


def _conv_bias_act_kernel(w_ref, p_ref, b_ref, o_ref, *, relu):
    """No-BN path: conv + bias + optional ReLU, single fused pass."""
    y = jnp.dot(w_ref[...], p_ref[...], preferred_element_type=jnp.float32)
    y = y + b_ref[...]
    if relu:
        y = jnp.maximum(y, 0.0)
    o_ref[...] = y.astype(o_ref.dtype)


def _compiler_params(sem):
    return pltpu.CompilerParams(dimension_semantics=sem,
                                vmem_limit_bytes=32 * 1024 * 1024)


# ---------------------------------------------------------------------------
# Wrapper
# ---------------------------------------------------------------------------
def basic_conv(x_nchw, weight, bias=None, gamma=None, beta=None, *,
               use_bn=True, eps=1e-3, nonlin="ReLU", tm=4096,
               mxu_dtype=jnp.bfloat16):
    """BasicConv('Conv2d', Ci, Co, k, bias=True, bn=BatchNorm2d,
    nonlin_name='ReLU'); stride=1, padding=0, BN in training mode."""
    if nonlin not in (None, "ReLU"):
        raise NotImplementedError(nonlin)
    # TODO(synk): only ReLU / identity nonlinearities are wired up here.
    relu = nonlin == "ReLU"

    N, Ci, H, W = x_nchw.shape
    Co, Ci_w, KH, KW = weight.shape
    assert Ci == Ci_w
    Ho, Wo = H - KH + 1, W - KW + 1
    M = N * Ho * Wo
    K = KH * KW * Ci

    # Tile along M (lane axis): multiple of 128, not wider than padded M.
    tm = max(128, (int(tm) // 128) * 128)
    tm = min(tm, max(128, pl.cdiv(M, 128) * 128))
    num_tiles = pl.cdiv(M, tm)
    M_pad = num_tiles * tm
    Co_p = ((Co + 7) // 8) * 8                        # sublane-pad channels

    # ---- layout glue (plain JAX): transposed im2col -> P (K, M) in bf16 ----
    # K ordered (kh, kw, ci); M ordered (n, ho, wo).
    cols = []
    for kh in range(KH):
        for kw in range(KW):
            cols.append(x_nchw[:, :, kh:kh + Ho, kw:kw + Wo])   # (N,Ci,Ho,Wo)
    p_t = jnp.stack(cols, axis=0)                     # (KH*KW, N, Ci, Ho, Wo)
    p_t = jnp.transpose(p_t, (0, 2, 1, 3, 4))         # (KH*KW, Ci, N, Ho, Wo)
    p_t = p_t.reshape(K, M)
    if M_pad != M:                                    # zero cols: inert in stats
        p_t = jnp.pad(p_t, ((0, 0), (0, M_pad - M)))
    p_t = p_t.astype(mxu_dtype)

    # weight (Co,Ci,KH,KW) -> (Co, K) with matching (kh,kw,ci) ordering.
    w_t = jnp.transpose(weight, (0, 2, 3, 1)).reshape(Co, K)
    if Co_p != Co:
        w_t = jnp.pad(w_t, ((0, Co_p - Co), (0, 0)))
    w_t = w_t.astype(mxu_dtype)

    if use_bn:
        # ------------- pass 1: conv + global batch-stat reduction -----------
        y, ysum, yssq = pl.pallas_call(
            _conv_stats_kernel,
            out_shape=(jax.ShapeDtypeStruct((Co_p, M_pad), jnp.float32),
                       jax.ShapeDtypeStruct((Co_p, 1), jnp.float32),
                       jax.ShapeDtypeStruct((Co_p, 1), jnp.float32)),
            grid_spec=pltpu.PrefetchScalarGridSpec(
                num_scalar_prefetch=0,
                grid=(num_tiles,),
                in_specs=[pl.BlockSpec((Co_p, K), lambda i: (0, 0)),
                          pl.BlockSpec((K, tm), lambda i: (0, i))],
                out_specs=[pl.BlockSpec((Co_p, tm), lambda i: (0, i)),
                           pl.BlockSpec((Co_p, 1), lambda i: (0, 0)),
                           pl.BlockSpec((Co_p, 1), lambda i: (0, 0))]),
            compiler_params=_compiler_params(("arbitrary",)),  # sequential reduction
        )(w_t, p_t)

        # O(Co) per-channel folding (wrapper glue).  Conv bias is dropped:
        # training-mode BN subtracts the batch mean, which cancels it exactly.
        mean = ysum[:, 0] / M
        var = jnp.maximum(yssq[:, 0] / M - mean * mean, 0.0)   # biased variance
        gamma_p = jnp.pad(gamma.astype(jnp.float32), (0, Co_p - Co))
        beta_p = jnp.pad(beta.astype(jnp.float32), (0, Co_p - Co))
        scale = gamma_p * lax.rsqrt(var + eps)
        shift = beta_p - mean * scale

        # ------------- pass 2: normalize + nonlinearity (parallel) ----------
        out_t = pl.pallas_call(
            functools.partial(_scale_shift_act_kernel, relu=relu),
            out_shape=jax.ShapeDtypeStruct((Co_p, M_pad), jnp.float32),
            grid_spec=pltpu.PrefetchScalarGridSpec(
                num_scalar_prefetch=0,
                grid=(num_tiles,),
                in_specs=[pl.BlockSpec((Co_p, tm), lambda i: (0, i)),
                          pl.BlockSpec((Co_p, 1), lambda i: (0, 0)),
                          pl.BlockSpec((Co_p, 1), lambda i: (0, 0))],
                out_specs=pl.BlockSpec((Co_p, tm), lambda i: (0, i))),
            compiler_params=_compiler_params(("parallel",)),   # 2 TCs on v7x
        )(y, scale.reshape(Co_p, 1), shift.reshape(Co_p, 1))
    else:
        b = jnp.zeros((Co,), jnp.float32) if bias is None else bias
        b_p = jnp.pad(b.astype(jnp.float32), (0, Co_p - Co)).reshape(Co_p, 1)
        out_t = pl.pallas_call(
            functools.partial(_conv_bias_act_kernel, relu=relu),
            out_shape=jax.ShapeDtypeStruct((Co_p, M_pad), jnp.float32),
            grid_spec=pltpu.PrefetchScalarGridSpec(
                num_scalar_prefetch=0,
                grid=(num_tiles,),
                in_specs=[pl.BlockSpec((Co_p, K), lambda i: (0, 0)),
                          pl.BlockSpec((K, tm), lambda i: (0, i)),
                          pl.BlockSpec((Co_p, 1), lambda i: (0, 0))],
                out_specs=pl.BlockSpec((Co_p, tm), lambda i: (0, i))),
            compiler_params=_compiler_params(("parallel",)),
        )(w_t, p_t, b_p)

    # (Co, M) -> NCHW
    out = out_t[:Co, :M].reshape(Co, N, Ho, Wo)
    return jnp.transpose(out, (1, 0, 2, 3))


# ---------------------------------------------------------------------------
# Reference (module semantics)
# ---------------------------------------------------------------------------
def _reference(x, weight, bias, gamma, beta, *, use_bn=True, eps=1e-3,
               nonlin="ReLU", cast_dtype=None):
    xx, ww = x, weight
    if cast_dtype is not None:                        # matched-precision check
        xx, ww = xx.astype(cast_dtype), ww.astype(cast_dtype)
    y = lax.conv_general_dilated(
        xx, ww, window_strides=(1, 1), padding="VALID",
        dimension_numbers=("NCHW", "OIHW", "NCHW"),
        preferred_element_type=jnp.float32)
    y = y + bias.reshape(1, -1, 1, 1)
    if use_bn:
        mean = jnp.mean(y, axis=(0, 2, 3), keepdims=True)
        var = jnp.mean((y - mean) ** 2, axis=(0, 2, 3), keepdims=True)
        y = (y - mean) * lax.rsqrt(var + eps)
        y = y * gamma.reshape(1, -1, 1, 1) + beta.reshape(1, -1, 1, 1)
    if nonlin == "ReLU":
        y = jnp.maximum(y, 0.0)
    return y


if __name__ == "__main__":
    # BasicConv('Conv2d', in_channels=4, out_channels=8, kernel_size=3,
    #           bias=True, bn=BatchNorm2d, nonlin_name='ReLU')
    N, Ci, H, W = 2, 4, 16, 16
    Co, Ksz = 8, 3

    key = jax.random.PRNGKey(0)
    kx, kw, kb, kg, kbeta = jax.random.split(key, 5)
    x = jax.random.normal(kx, (N, Ci, H, W), dtype=jnp.float32)
    weight = jax.random.normal(kw, (Co, Ci, Ksz, Ksz), dtype=jnp.float32) * 0.1
    bias = jax.random.normal(kb, (Co,), dtype=jnp.float32) * 0.1
    gamma = 1.0 + 0.1 * jax.random.normal(kg, (Co,), dtype=jnp.float32)
    beta = 0.1 * jax.random.normal(kbeta, (Co,), dtype=jnp.float32)

    # Small tm so the demo exercises a multi-step, pipelined grid:
    # M = 2*14*14 = 392 -> padded to 512 -> 4 tiles of 128 lanes.
    fwd = jax.jit(functools.partial(
        basic_conv, use_bn=True, eps=1e-3, nonlin="ReLU", tm=128))
    out = jax.block_until_ready(fwd(x, weight, bias, gamma, beta))
    assert out.shape == (N, Co, H - Ksz + 1, W - Ksz + 1)

    # Matched-precision reference (bf16 operands, f32 accumulation).
    ref_bf16 = _reference(x, weight, bias, gamma, beta, use_bn=True, eps=1e-3,
                          nonlin="ReLU", cast_dtype=jnp.bfloat16)
    assert jnp.allclose(out, ref_bf16, rtol=2e-3, atol=2e-3), \
        float(jnp.max(jnp.abs(out - ref_bf16)))

    # Full-f32 module semantics; loose tolerance covers bf16 MXU inputs.
    ref_f32 = _reference(x, weight, bias, gamma, beta, use_bn=True, eps=1e-3,
                         nonlin="ReLU", cast_dtype=None)
    assert jnp.allclose(out, ref_f32, rtol=1e-1, atol=1e-1)

    # Also exercise the fused no-BN path once.
    out_nobn = jax.block_until_ready(jax.jit(functools.partial(
        basic_conv, use_bn=False, nonlin="ReLU", tm=128))(
            x, weight, bias, gamma, beta))
    ref_nobn = _reference(x, weight, bias, gamma, beta, use_bn=False,
                          nonlin="ReLU", cast_dtype=jnp.bfloat16)
    assert jnp.allclose(out_nobn, ref_nobn, rtol=2e-3, atol=2e-3)

    print("KERNEL_OK")
</pallas_src>

<mosaic_0001>
module attributes {stable_mosaic.version = 11 : i64} {
  func.func @_conv_stats_kernel(%arg0: i32, %arg1: memref<8x36xbf16, #tpu.memory_space<vmem>>, %arg2: memref<36x128xbf16, #tpu.memory_space<vmem>>, %arg3: memref<8x128xf32, #tpu.memory_space<vmem>>, %arg4: memref<8x1xf32, #tpu.memory_space<vmem>>, %arg5: memref<8x1xf32, #tpu.memory_space<vmem>>) attributes {dimension_semantics = [#tpu.dimension_semantics<arbitrary>], iteration_bounds = array<i64: 4>, scalar_prefetch = 0 : i64, scratch_operands = 0 : i64, tpu.core_type = #tpu.core_type<tc>, window_params = [{pipeline_mode = #tpu.pipeline_mode<synchronous>, transform_indices = @transform_0, window_bounds = array<i64: 8, 36>}, {transform_indices = @transform_1, window_bounds = array<i64: 36, 128>}, {transform_indices = @transform_2, window_bounds = array<i64: 8, 128>}, {pipeline_mode = #tpu.pipeline_mode<synchronous>, transform_indices = @transform_3, window_bounds = array<i64: 8, 1>}, {pipeline_mode = #tpu.pipeline_mode<synchronous>, transform_indices = @transform_4, window_bounds = array<i64: 8, 1>}]} {
    %c0 = arith.constant 0 : index
    %c0_0 = arith.constant 0 : index
    %0 = vector.load %arg1[%c0, %c0_0] : memref<8x36xbf16, #tpu.memory_space<vmem>>, vector<8x36xbf16>
    %c0_1 = arith.constant 0 : index
    %c0_2 = arith.constant 0 : index
    %1 = vector.load %arg2[%c0_1, %c0_2] : memref<36x128xbf16, #tpu.memory_space<vmem>>, vector<36x128xbf16>
    %cst = arith.constant dense<0.000000e+00> : vector<8x128xf32>
    %2 = tpu.matmul %0, %1, %cst {dimension_numbers = #tpu.dot_dimension_numbers<[1], [0], [0], [1], [0, 0, 1, 1], [], []>} : vector<8x36xbf16>, vector<36x128xbf16>, vector<8x128xf32> -> vector<8x128xf32>
    %c0_3 = arith.constant 0 : index
    %c0_4 = arith.constant 0 : index
    %3 = vector.load %arg3[%c0_3, %c0_4] : memref<8x128xf32, #tpu.memory_space<vmem>>, vector<8x128xf32>
    tpu.vector_store %arg3[%c0_3, %c0_4], %2 {strides = array<i32>} : memref<8x128xf32, #tpu.memory_space<vmem>>, vector<8x128xf32>,
    %c0_i32 = arith.constant 0 : i32
    %4 = arith.cmpi eq, %arg0, %c0_i32 : i32
    %5 = arith.extui %4 : i1 to i32
    %c0_i32_5 = arith.constant 0 : i32
    %6 = arith.cmpi ne, %5, %c0_i32_5 : i32
    scf.if %6 {
      %cst_16 = arith.constant 0.000000e+00 : f32
      %18 = vector.broadcast %cst_16 : f32 to vector<8x1xf32>
      %c0_17 = arith.constant 0 : index
      %c0_18 = arith.constant 0 : index
      %19 = vector.load %arg4[%c0_17, %c0_18] : memref<8x1xf32, #tpu.memory_space<vmem>>, vector<8x1xf32>
      tpu.vector_store %arg4[%c0_17, %c0_18], %18 {strides = array<i32>} : memref<8x1xf32, #tpu.memory_space<vmem>>, vector<8x1xf32>,
      %cst_19 = arith.constant 0.000000e+00 : f32
      %20 = vector.broadcast %cst_19 : f32 to vector<8x1xf32>
      %c0_20 = arith.constant 0 : index
      %c0_21 = arith.constant 0 : index
      %21 = vector.load %arg5[%c0_20, %c0_21] : memref<8x1xf32, #tpu.memory_space<vmem>>, vector<8x1xf32>
      tpu.vector_store %arg5[%c0_20, %c0_21], %20 {strides = array<i32>} : memref<8x1xf32, #tpu.memory_space<vmem>>, vector<8x1xf32>,
    } else {
    }
    %c0_6 = arith.constant 0 : index
    %c0_7 = arith.constant 0 : index
    %7 = vector.load %arg4[%c0_6, %c0_7] : memref<8x1xf32, #tpu.memory_space<vmem>>, vector<8x1xf32>
    %cst_8 = arith.constant dense<0.000000e+00> : vector<8xf32>
    %8 = vector.multi_reduction <add>, %2, %cst_8 [1] : vector<8x128xf32> to vector<8xf32>
    %9 = vector.shape_cast %8 : vector<8xf32> to vector<8x1xf32>
    %10 = arith.addf %7, %9 : vector<8x1xf32>
    %c0_9 = arith.constant 0 : index
    %c0_10 = arith.constant 0 : index
    %11 = vector.load %arg4[%c0_9, %c0_10] : memref<8x1xf32, #tpu.memory_space<vmem>>, vector<8x1xf32>
    tpu.vector_store %arg4[%c0_9, %c0_10], %10 {strides = array<i32>} : memref<8x1xf32, #tpu.memory_space<vmem>>, vector<8x1xf32>,
    %c0_11 = arith.constant 0 : index
    %c0_12 = arith.constant 0 : index
    %12 = vector.load %arg5[%c0_11, %c0_12] : memref<8x1xf32, #tpu.memory_space<vmem>>, vector<8x1xf32>
    %13 = arith.mulf %2, %2 : vector<8x128xf32>
    %cst_13 = arith.constant dense<0.000000e+00> : vector<8xf32>
    %14 = vector.multi_reduction <add>, %13, %cst_13 [1] : vector<8x128xf32> to vector<8xf32>
    %15 = vector.shape_cast %14 : vector<8xf32> to vector<8x1xf32>
    %16 = arith.addf %12, %15 : vector<8x1xf32>
    %c0_14 = arith.constant 0 : index
    %c0_15 = arith.constant 0 : index
    %17 = vector.load %arg5[%c0_14, %c0_15] : memref<8x1xf32, #tpu.memory_space<vmem>>, vector<8x1xf32>
    tpu.vector_store %arg5[%c0_14, %c0_15], %16 {strides = array<i32>} : memref<8x1xf32, #tpu.memory_space<vmem>>, vector<8x1xf32>,
    return
  }
  func.func @transform_0(%arg0: i32) -> (i32, i32) {
    %c0_i32 = arith.constant 0 : i32
    %c0_i32_0 = arith.constant 0 : i32
    %c0_i32_1 = arith.constant 0 : i32
    return %c0_i32, %c0_i32_0 : i32, i32
  }
  func.func @transform_1(%arg0: i32) -> (i32, i32) {
    %c0_i32 = arith.constant 0 : i32
    %c0_i32_0 = arith.constant 0 : i32
    return %c0_i32, %arg0 : i32, i32
  }
  func.func @transform_2(%arg0: i32) -> (i32, i32) {
    %c0_i32 = arith.constant 0 : i32
    %c0_i32_0 = arith.constant 0 : i32
    return %c0_i32, %arg0 : i32, i32
  }
  func.func @transform_3(%arg0: i32) -> (i32, i32) {
    %c0_i32 = arith.constant 0 : i32
    %c0_i32_0 = arith.constant 0 : i32
    %c0_i32_1 = arith.constant 0 : i32
    return %c0_i32, %c0_i32_0 : i32, i32
  }
  func.func @transform_4(%arg0: i32) -> (i32, i32) {
    %c0_i32 = arith.constant 0 : i32
    %c0_i32_0 = arith.constant 0 : i32
    %c0_i32_1 = arith.constant 0 : i32
    return %c0_i32, %c0_i32_0 : i32, i32
  }
}

module attributes {stable_mosaic.version = 11 : i64} {
  func.func @_scale_shift_act_kernel(%arg0: i32, %arg1: memref<8x128xf32, #tpu.memory_space<vmem>>, %arg2: memref<8x1xf32, #tpu.memory_space<vmem>>, %arg3: memref<8x1xf32, #tpu.memory_space<vmem>>, %arg4: memref<8x128xf32, #tpu.memory_space<vmem>>) attributes {dimension_semantics = [#tpu.dimension_semantics<parallel>], iteration_bounds = array<i64: 4>, scalar_prefetch = 0 : i64, scratch_operands = 0 : i64, tpu.core_type = #tpu.core_type<tc>, window_params = [{transform_indices = @transform_0, window_bounds = array<i64: 8, 128>}, {pipeline_mode = #tpu.pipeline_mode<synchronous>, transform_indices = @transform_1, window_bounds = array<i64: 8, 1>}, {pipeline_mode = #tpu.pipeline_mode<synchronous>, transform_indices = @transform_2, window_bounds = array<i64: 8, 1>}, {transform_indices = @transform_3, window_bounds = array<i64: 8, 128>}]} {
    %c0 = arith.constant 0 : index
    %c0_0 = arith.constant 0 : index
    %0 = vector.load %arg1[%c0, %c0_0] : memref<8x128xf32, #tpu.memory_space<vmem>>, vector<8x128xf32>
    %c0_1 = arith.constant 0 : index
    %c0_2 = arith.constant 0 : index
    %1 = vector.load %arg2[%c0_1, %c0_2] : memref<8x1xf32, #tpu.memory_space<vmem>>, vector<8x1xf32>
    %2 = vector.broadcast %1 : vector<8x1xf32> to vector<8x128xf32>
    %3 = arith.mulf %0, %2 : vector<8x128xf32>
    %c0_3 = arith.constant 0 : index
    %c0_4 = arith.constant 0 : index
    %4 = vector.load %arg3[%c0_3, %c0_4] : memref<8x1xf32, #tpu.memory_space<vmem>>, vector<8x1xf32>
    %5 = vector.broadcast %4 : vector<8x1xf32> to vector<8x128xf32>
    %6 = arith.addf %3, %5 : vector<8x128xf32>
    %cst = arith.constant 0.000000e+00 : f32
    %7 = vector.broadcast %cst : f32 to vector<8x128xf32>
    %8 = arith.maximumf %6, %7 : vector<8x128xf32>
    %c0_5 = arith.constant 0 : index
    %c0_6 = arith.constant 0 : index
    %9 = vector.load %arg4[%c0_5, %c0_6] : memref<8x128xf32, #tpu.memory_space<vmem>>, vector<8x128xf32>
    tpu.vector_store %arg4[%c0_5, %c0_6], %8 {strides = array<i32>} : memref<8x128xf32, #tpu.memory_space<vmem>>, vector<8x128xf32>,
    return
  }
  func.func @transform_0(%arg0: i32) -> (i32, i32) {
    %c0_i32 = arith.constant 0 : i32
    %c0_i32_0 = arith.constant 0 : i32
    return %c0_i32, %arg0 : i32, i32
  }
  func.func @transform_1(%arg0: i32) -> (i32, i32) {
    %c0_i32 = arith.constant 0 : i32
    %c0_i32_0 = arith.constant 0 : i32
    %c0_i32_1 = arith.constant 0 : i32
    return %c0_i32, %c0_i32_0 : i32, i32
  }
  func.func @transform_2(%arg0: i32) -> (i32, i32) {
    %c0_i32 = arith.constant 0 : i32
    %c0_i32_0 = arith.constant 0 : i32
    %c0_i32_1 = arith.constant 0 : i32
    return %c0_i32, %c0_i32_0 : i32, i32
  }
  func.func @transform_3(%arg0: i32) -> (i32, i32) {
    %c0_i32 = arith.constant 0 : i32
    %c0_i32_0 = arith.constant 0 : i32
    return %c0_i32, %arg0 : i32, i32
  }
}

</mosaic_0001>

<bundles_post_ra>
// kernel: basic_conv.3
= control target key start
LH: loop header
LB: loop body
LE: loop exit
PB: predicated region body
PF: predicated region fallthrough
CT: control target
= control target key end

     0   :  { %s284_s12 = smov 0   ;;  %s301_s0 = inlined_call_operand.vmem [shape: f32[8,512], index: 0, kind: input, shape index: {}]   ;;  %s302_s1 = inlined_call_operand.vmem [shape: f32[8,1], index: 1, kind: input, shape index: {}]   ;;  %s303_s2 = inlined_call_operand.vmem [shape: f32[8,1], index: 2, kind: input, shape index: {}]   ;;  %s304_s3 = inlined_call_operand.vmem [shape: f32[8,512], index: 3, kind: output, shape index: {}]  }
   0x1 LB: > { %s236_s13 = sadd.s32 4294967295, %s261_s12   ;;  %p240_p0 = scmp.ge.s32.totalorder %s261_s12, 1  ;;  %s261_s12 = sphi %s284_s12, %s13_s12  }
   0x2   : > { %p136_p1 = scmp.lt.s32.totalorder %s261_s12, 5 }
   0x4   : > { %p137_p2 = pnand %p240_p0, %p136_p1 }
   0x5   : > { %v167_v0 = vld [vmem:[%s302_s1] sm:$0xff] (!%p137_p2)  ;;  %v263_v1 = vmov (!%p137_p2), 0   ;;  %p158_p3 = scmp.lt.s32.totalorder (!%p137_p2), %s236_s13, 3 }
   0x6   : > { %140 = sbr.rel (%p137_p2) target bundleno = 144 (0x90), region = 32  ;;  %254 = vset.pattern.permute.xlu0 (!%p137_p2), %v263_v1  ;;  %v174_v2 = vld [vmem:[%s303_s2] sm:$0xff] (!%p137_p2) }
   0x7   : > { %170 = vperm.xlu0 (!%p137_p2), %254, %v167_v0  }
   0xb   : > { %177 = vperm.xlu0 (!%p137_p2), %254, %v174_v2  }
   0xd   : > { %s306_s13 = smov (!%p158_p3, %s236_s13), 3 }
   0xe   : > { %s241_s18 = sshll.u32 %s306_s13, 3 }
   0xf   : > { %s161_s21 = scalar_lea.vmem %s301_s0, %s241_s18  ;;  %s165_s24 = scalar_lea.vmem %s304_s3, %s241_s18 }
  0x10   : > { %v166_v4 = vld [vmem:[%s161_s21] sm:$0xff] }
  0x86   : > { %v171_v3 = vpop.permute.xlu0 %170 }
  0x87   : > { %v173_v5 = vmul.f32 %v171_v3, %v166_v4 }
  0x8a   : > { %v178_v6 = vpop.permute.xlu0 %177 }
  0x8b   : > { %v180_v7 = vadd.f32 %v178_v6, %v173_v5 }
  0x8d   : > { %v181_v8 = vmax.f32 %v180_v7, 0.0 }
  0x8f   : > { %182 = vst [vmem:[%s165_s24] sm:$0xff] %v181_v8 }
  0x90 PF: > { %s13_s12 = sadd.s32 1, %s261_s12  }
  0x91   : > { %p10_p4 = scmp.ge.s32.totalorder %s13_s12, 6  }
  0x93   :  { %12 = sbr.rel (!%p10_p4) target bundleno = 1 (0x1), region = 62 }

// kernel: basic_conv.2
= control target key start
LH: loop header
LB: loop body
LE: loop exit
PB: predicated region body
PF: predicated region fallthrough
CT: control target
= control target key end

     0   :  { %s521_s15 = smov 0   ;;  %s523_s16 = smov 0   ;;  %s597_s0 = inlined_call_operand.vmem [shape: bf16[8,36], index: 0, kind: input, shape index: {}]   ;;  %s598_s1 = inlined_call_operand.vmem [shape: bf16[36,512], index: 1, kind: input, shape index: {}]   ;;  %s599_s2 = inlined_call_operand.vmem [shape: f32[8,512], index: 2, kind: output, shape index: {0}]   ;;  %s600_s3 = inlined_call_operand.vmem [shape: f32[8,1], index: 3, kind: output, shape index: {1}]   ;;  %s601_s4 = inlined_call_operand.vmem [shape: f32[8,1], index: 4, kind: output, shape index: {2}]  }
   0x1   :  { %s525_s17 = smov 0  }
   0x2 LB: > { %s537_s18 = sadd.s32 4294967295, %s491_s17   ;;  %s540_s19 = sadd.s32 1, %s491_s17   ;;  %s491_s17 = sphi %s525_s17, %s604_s17   ;;  %s487_s16 = sphi %s523_s16, %s603_s16   ;;  %s483_s15 = sphi %s521_s15, %s602_s15  }
   0x3   : > { %s40_s20 = ssub.s32 %s491_s17, %s540_s19  ;;  %s43_s21 = sadd.s32 1, %s487_s16 }
   0x4   : > { %p41_p0 = scmp.eq.s32.totalorder %s40_s20, 0  ;;  %p50_p1 = scmp.ne.s32.totalorder %s487_s16, %s483_s15 }
   0x5   : > { %p51_p2 = scmp.eq.s32.totalorder %s491_s17, 0  ;;  %p412_p4 = scmp.ge.s32.totalorder %s491_s17, 4 }
   0x6   : > { %s549_s22 = scalar_select %p41_p0, %s487_s16, %s43_s21  }
   0x7   : > { %p52_p3 = por %p51_p2, %p50_p1  ;;  %147 = sbr.rel (%p412_p4) target bundleno = 21 (0x15), region = 20 }
   0xe   : > { %150 = sbr.rel (!%p52_p3) target bundleno = 21 (0x15), region = 24  ;;  %s152_s23 = sand.u32 (%p52_p3), 1, %s487_s16  }
   0xf   : > { %s413_s24 = sshll.u32 (%p52_p3), %s491_s17, 2  ;;  %s437_s25 = smul.u32 (%p52_p3), 20, %s152_s23 }
  0x10   : > { %s156_s28 = scalar_lea.vmem (%p52_p3), %s598_s1, %s413_s24 }
  0x11   : > { %v172_v0 = vld [vmem:[%s156_s28] sm:$0xf] (%p52_p3)  ;;  %v174_v1 = vld [vmem:[%s156_s28 + $0x10] sm:$0xf] (%p52_p3)  ;;  %s154_s29 = scalar_lea.vmem (%p52_p3), [#allocation2], %s437_s25 }
  0x12   : > { %v176_v2 = vld [vmem:[%s156_s28 + $0x20] sm:$0xf] (%p52_p3)  ;;  %v178_v3 = vld [vmem:[%s156_s28 + $0x30] sm:$0xf] (%p52_p3)  ;;  %173 = vst [vmem:[%s154_s29] sm:$0xf] (%p52_p3), %v172_v0 }
  0x13   : > { %v180_v4 = vld [vmem:[%s156_s28 + $0x40] sm:$0xf] (%p52_p3)  ;;  %175 = vst [vmem:[%s154_s29 + $0x4] sm:$0xf] (%p52_p3), %v174_v1  ;;  %177 = vst [vmem:[%s154_s29 + $0x8] sm:$0xf] (%p52_p3), %v176_v2 }
  0x14   : > { %179 = vst [vmem:[%s154_s29 + $0xc] sm:$0xf] (%p52_p3), %v178_v3  ;;  %181 = vst [vmem:[%s154_s29 + $0x10] sm:$0xf] (%p52_p3), %v180_v4 }
  0x15 PF: > { %p414_p5 = scmp.ge.s32.totalorder %s491_s17, 1  ;;  %p213_p6 = scmp.lt.s32.totalorder %s491_s17, 5 }
  0x17   : > { %p214_p7 = pnand %p414_p5, %p213_p6 }
  0x18   : > { %s220_s30 = sand.u32 (!%p214_p7), 1, %s483_s15   ;;  %v493_v5 = vmov (!%p214_p7), 0.0   ;;  %vm494_vm0 = vmmov (!%p214_p7), 0   ;;  %vm274_vm1 = vcmask (!%p214_p7), 1041408   ;;  %v249_v10 = vld [vmem:[%s597_s0] sm:$0xf] (!%p214_p7) }
  0x19   : > { %217 = sbr.rel (%p214_p7) target bundleno = 405 (0x195), region = 65  ;;  %427 = vmatprep.subr.bf16.mxu0 (!%p214_p7), %v493_v5  ;;  %433 = vmatprep.mubr.msk.bf16.mxu0 (!%p214_p7), %vm494_vm0, %v493_v5  ;;  %vm270_vm2 = vcmask (!%p214_p7), 293888   ;;  %p244_p8 = scmp.lt.s32.totalorder (!%p214_p7), %s537_s18, 3 }
  0x1a   : > { %s438_s5 = smul.u32 (!%p214_p7), 20, %s220_s30  ;;  %p420_p9 = scmp.ne.s32.totalorder (!%p214_p7), %s537_s18, 0 }
  0x1c   : > { %s222_s6 = scalar_lea.vmem (!%p214_p7), [#allocation2], %s438_s5 }
  0x1d   : > { %v466_v6 = vld [vmem:[%s222_s6] sm:$0xff] (!%p214_p7)   ;;  %v467_v7 = vld [vmem:[%s222_s6 + $0x8] sm:$0xff] (!%p214_p7)   ;;  %v468_v8 = vld [vmem:[%s222_s6 + $0x10] ss:$0 sps:$4 sm:$0x33] (!%p214_p7)  }
  0x1e   : > { %428 = vmatpush3.bf16.msra.mxu0 (!%p214_p7), %v466_v6  ;;  %v276_v9 = vsel (!%p214_p7), %vm274_vm1, %v468_v8, 0 }
  0x1f   : > { %429 = vmatprep.subr.bf16.mxu0 (!%p214_p7), %v493_v5 }
  0x20   : > { %s245_s9 = scalar_select %p244_p8, %s537_s18, 3 }
  0x21   : > { %vm323_vm3 = vcmask (!%p420_p9), 7168   ;;  %v495_v15 = vmov (!%p420_p9), 0.0  }
  0x22   : > { %430 = vmatpush3.bf16.msra.mxu0 %v467_v7  ;;  %s415_s10 = sshll.u32 %s245_s9, 3  ;;  %324 = vst.msk [vmem:[%s600_s3] sm:$0xff] (!%p420_p9), %vm323_vm3, %v495_v15  ;;  %325 = vst.msk [vmem:[%s601_s4] sm:$0xff] (!%p420_p9), %vm323_vm3, %v495_v15 }
  0x23   : > { %431 = vmatprep.subr.bf16.mxu0 %v493_v5  ;;  %s247_s13 = scalar_lea.vmem %s599_s2, %s415_s10 }
  0x26   : > { %432 = vmatpush3.bf16.msra.mxu0 %v276_v9 }
  0x29   : > { %434 = vmatmul.mubr.msk.bf16.vlgmr.msra.gmra.mrb[0].mxu0 %vm270_vm2, %v249_v10 }
  0xf9   : > { %322 = sbr.rel (%p420_p9) target bundleno = 256 (0x100), region = 73 }
  0xfc   : > { %v312_v11 = vpop.f32.mrb[0].mxu0 }
  0xfd   : > { %318 = vst [vmem:[%s247_s13] sm:$0xff] %v312_v11  ;;  %v435_v12 = vpop.f32.mrb[1].mxu0 }
  0xfe   : > { %v315_v13 = vpop.f32.mrb[2].mxu0 }
  0xff   : > { %v436_v14 = vpop.f32.mrb[3].mxu0 }
 0x100 PF: > { %327 = vadd.xlane.f32.xlu0 %v312_v11  ;;  %v333_v16 = vmul.f32 %v312_v11, %v312_v11  ;;  %v326_v17 = vld [vmem:[%s600_s3] sm:$0xff]  ;;  %vm330_vm4 = vcmask 7168  }
 0x101   : > { %v332_v20 = vld [vmem:[%s601_s4] sm:$0xff] }
 0x104   : > { %334 = vadd.xlane.f32.xlu0 %v333_v16 }
 0x18d   : > { %v328_v18 = vpop.xlane.xlu0 %327 }
 0x18e   : > { %v329_v19 = vadd.f32 %v328_v18, %v326_v17 }
 0x190   : > { %331 = vst.msk [vmem:[%s600_s3] sm:$0xff] %vm330_vm4, %v329_v19 }
 0x191   : > { %v335_v21 = vpop.xlane.xlu0 %334 }
 0x192   : > { %v336_v22 = vadd.f32 %v335_v21, %v332_v20 }
 0x194   : > { %337 = vst.msk [vmem:[%s601_s4] sm:$0xff] %vm330_vm4, %v336_v22 }
 0x195 PF: > { %p12_p10 = scmp.ge.s32.totalorder %s540_s19, 6   ;;  %s602_s15 = smov %s487_s16 }
 0x196   : > { %s603_s16 = smov %s549_s22  ;;  %s604_s17 = smov %s540_s19 }
 0x197   :  { %14 = sbr.rel (!%p12_p10) target bundleno = 2 (0x2), region = 124 }

</bundles_post_ra>
